<compile_context>
chip_gen: v7x
topology: tpu7x:2x2x1
jax: 0.10.0
libtpu: 0.0.40
codegen_flags: <defaults>
</compile_context>

<pallas_src>
import functools
import math

import jax
import jax.numpy as jnp
from jax import lax
from jax.experimental import pallas as pl
from jax.experimental.pallas import tpu as pltpu


# ---------------------------------------------------------------------------
# Pallas kernel: fused ChannelMix for one (batch, token-tile) grid step.
# ---------------------------------------------------------------------------
def channelmix_kernel(x_ref, prev_ref, next_ref, mk_ref, mr_ref,
                      wk_ref, wv_ref, wr_ref, o_ref, *, g2, shift):
    xt = x_ref[0].astype(jnp.float32)              # (TL, Cp)
    tl, cp = xt.shape
    s = shift

    # ---- bidirectional token shift: XLU roll + halo splice (no scratch) ----
    # forward-shifted rows:  fwd[t] = x[t - s]   (rows [0, s) come from prev tile)
    # backward-shifted rows: bwd[t] = x[t + s]   (rows [tl-s, tl) from next tile)
    fwd = pltpu.roll(xt, shift=s, axis=0)
    bwd = pltpu.roll(xt, shift=tl - s, axis=0)
    row = lax.broadcasted_iota(jnp.int32, (tl, 1), 0)
    for j in range(s):                             # s is tiny (usually 1)
        # NOTE: s < 8 -> these tiny halo loads are masked; negligible.
        prev_j = prev_ref[pl.ds(j, 1), :].astype(jnp.float32)   # (1, Cp)
        next_j = next_ref[pl.ds(j, 1), :].astype(jnp.float32)   # (1, Cp)
        fwd = jnp.where(row == j, prev_j, fwd)
        bwd = jnp.where(row == (tl - s + j), next_j, bwd)

    chan = lax.broadcasted_iota(jnp.int32, (1, cp), 1)
    xx = jnp.where(chan < g2, fwd, bwd)

    # ---- channel mix (VPU, f32):  x*m + xx*(1-m)  ==  xx + (x-xx)*m --------
    d = xt - xx
    xk = xx + d * mk_ref[...]
    xr = xx + d * mr_ref[...]

    # ---- projections on the MXU (bf16 operands, f32 accumulation) ----------
    k = jnp.dot(xk.astype(jnp.bfloat16), wk_ref[...],
                preferred_element_type=jnp.float32)             # (TL, Hp)
    k = jnp.square(jnp.maximum(k, 0.0))
    # TODO(synk): key_norm (LayerNorm over the hidden dim) is not implemented;
    # this kernel computes the module's default key_norm=False path.
    kv = jnp.dot(k.astype(jnp.bfloat16), wv_ref[...],
                 preferred_element_type=jnp.float32)            # (TL, Cp)
    r = jnp.dot(xr.astype(jnp.bfloat16), wr_ref[...],
                preferred_element_type=jnp.float32)             # (TL, Cp)
    o_ref[0] = (jax.nn.sigmoid(r) * kv).astype(o_ref.dtype)


# ---------------------------------------------------------------------------
# Wrapper helpers.
# ---------------------------------------------------------------------------
def _round_up(v, m):
    return ((v + m - 1) // m) * m


def _pad_axis(a, axis, to):
    pad = to - a.shape[axis]
    if pad == 0:
        return a
    widths = [(0, 0)] * a.ndim
    widths[axis] = (0, pad)
    return jnp.pad(a, widths)


def _choose_token_tile(L, target=512):
    """Multiple-of-8 token tile <= target; prefers an exact divisor of L."""
    L8 = _round_up(L, 8)
    if L8 <= target:
        return L8
    for t in range(target - target % 8, 127, -8):
        if L8 % t == 0:
            return t
    return target          # L will be zero-padded up to a multiple of this


def prepare_channelmix_params(params, *, compute_dtype=jnp.bfloat16):
    """Pad channel dims to multiples of 128 and cast matmul weights to the
    MXU compute dtype.  Call ONCE per layer (outside the per-forward path)."""
    Wk, Wv, Wr = params['Wk'], params['Wv'], params['Wr']
    C, Hd = Wk.shape
    Cp, Hp = _round_up(C, 128), _round_up(Hd, 128)
    return dict(
        C=C, Cp=Cp, Hp=Hp,
        mix_k=_pad_axis(params['mix_k'].reshape(1, C).astype(jnp.float32), 1, Cp),
        mix_r=_pad_axis(params['mix_r'].reshape(1, C).astype(jnp.float32), 1, Cp),
        Wk=_pad_axis(_pad_axis(Wk, 0, Cp), 1, Hp).astype(compute_dtype),
        Wv=_pad_axis(_pad_axis(Wv, 0, Hp), 1, Cp).astype(compute_dtype),
        Wr=_pad_axis(_pad_axis(Wr, 0, Cp), 1, Cp).astype(compute_dtype),
    )


def _vmem_limit_bytes():
    try:
        cap = pltpu.get_tpu_info().vmem_capacity_bytes
    except Exception:
        cap = 64 * 1024 * 1024
    # Stay well below physical (v7x: 64 MiB, v5e/v6e: 128 MiB).
    return min(int(cap * 3 // 4), 100 * 1024 * 1024)


def vrwkv_channelmix_forward(x, prep, patch_resolution=None, *,
                             shift_pixel=1, channel_gamma=0.25,
                             token_tile=None):
    """Pallas-backed forward of VRWKV_ChannelMix (key_norm=False)."""
    # TODO(synk): the repo's `bi_token_shift` source is not provided; this
    # follows the standard bidirectional token shift along the flattened
    # sequence (first 2*gamma*C channels shifted +shift_pixel tokens, the rest
    # shifted -shift_pixel tokens, zero padded), so patch_resolution is unused.
    del patch_resolution
    B, L, C = x.shape
    assert C == prep['C'], (C, prep['C'])
    Cp, Hp = prep['Cp'], prep['Hp']
    s = int(shift_pixel)
    g2 = int(C * channel_gamma * 2)

    TL = int(token_tile) if token_tile is not None else _choose_token_tile(L)
    assert TL % 8 == 0 and TL > s, (TL, s)
    L_pad = _round_up(L, TL)
    NL = L_pad // TL

    # ---- lane-dense channel padding + token padding (padded rows/cols = 0) -
    x_p = _pad_axis(_pad_axis(x, 2, Cp), 1, L_pad)            # keeps x.dtype

    # ---- per-tile halo rows via pure slicing (no pad+gather of full x) ------
    xt4 = x_p.reshape(B, NL, TL, Cp)
    zeros_h = jnp.zeros((B, 1, s, Cp), x_p.dtype)
    prev_rows = jnp.concatenate([zeros_h, xt4[:, :NL - 1, TL - s:, :]], axis=1)
    next_rows = jnp.concatenate([xt4[:, 1:, :s, :], zeros_h], axis=1)

    # ---- block specs --------------------------------------------------------
    x_spec = pl.BlockSpec((1, TL, Cp), lambda b, l: (b, l, 0))
    halo_spec = pl.BlockSpec((None, None, s, Cp), lambda b, l: (b, l, 0, 0))
    row_spec = pl.BlockSpec((1, Cp), lambda b, l: (0, 0))
    # Constant index_maps: weights are DMA'd once and stay VMEM-resident.
    # (bf16 halves their footprint; single-buffering them via pl.Buffered(1)
    # would shave another copy if VMEM ever gets tight on v7x.)
    wk_spec = pl.BlockSpec((Cp, Hp), lambda b, l: (0, 0))
    wv_spec = pl.BlockSpec((Hp, Cp), lambda b, l: (0, 0))
    wr_spec = pl.BlockSpec((Cp, Cp), lambda b, l: (0, 0))

    kernel = functools.partial(channelmix_kernel, g2=g2, shift=s)

    out_p = pl.pallas_call(
        kernel,
        out_shape=jax.ShapeDtypeStruct((B, L_pad, Cp), x.dtype),
        grid=(B, NL),
        in_specs=[x_spec, halo_spec, halo_spec, row_spec, row_spec,
                  wk_spec, wv_spec, wr_spec],
        out_specs=x_spec,
        compiler_params=pltpu.CompilerParams(
            dimension_semantics=("parallel", "parallel"),
            vmem_limit_bytes=_vmem_limit_bytes()),
    )(x_p, prev_rows, next_rows, prep['mix_k'], prep['mix_r'],
      prep['Wk'], prep['Wv'], prep['Wr'])

    return out_p[:, :L, :C]


# ---------------------------------------------------------------------------
# Pure-JAX reference + deterministic parameter init (mirrors 'fancy' init).
# ---------------------------------------------------------------------------
def bi_token_shift(x, shift_pixel, gamma):
    B, N, C = x.shape
    g2 = int(C * gamma * 2)
    fwd = jnp.concatenate(
        [jnp.zeros((B, shift_pixel, g2), x.dtype), x[:, :N - shift_pixel, :g2]],
        axis=1)
    bwd = jnp.concatenate(
        [x[:, shift_pixel:, g2:], jnp.zeros((B, shift_pixel, C - g2), x.dtype)],
        axis=1)
    return jnp.concatenate([fwd, bwd], axis=-1)


def channelmix_ref(x, params, shift_pixel=1, channel_gamma=0.25):
    hp = jax.lax.Precision.HIGHEST
    xx = bi_token_shift(x, shift_pixel, channel_gamma)
    mk, mr = params['mix_k'], params['mix_r']
    xk = x * mk + xx * (1.0 - mk)
    xr = x * mr + xx * (1.0 - mr)
    k = jnp.square(jnp.maximum(jnp.dot(xk, params['Wk'], precision=hp), 0.0))
    kv = jnp.dot(k, params['Wv'], precision=hp)
    return jax.nn.sigmoid(jnp.dot(xr, params['Wr'], precision=hp)) * kv


def init_params(key, n_embd, n_layer, layer_id, hidden_rate=4):
    C = n_embd
    Hd = hidden_rate * n_embd
    ratio_1_to_almost0 = 1.0 - layer_id / n_layer
    xarr = jnp.arange(C, dtype=jnp.float32) / C
    mix_k = xarr ** ratio_1_to_almost0
    mix_r = xarr ** ratio_1_to_almost0
    kk, kv, kr = jax.random.split(key, 3)
    # stored as (in, out) so that y = x @ W  (== torch Linear with weight W.T)
    Wk = jax.random.uniform(kk, (C, Hd), jnp.float32,
                            -1.0 / math.sqrt(C), 1.0 / math.sqrt(C))
    Wv = jax.random.uniform(kv, (Hd, C), jnp.float32,
                            -1.0 / math.sqrt(Hd), 1.0 / math.sqrt(Hd))
    Wr = jax.random.uniform(kr, (C, C), jnp.float32,
                            -1.0 / math.sqrt(C), 1.0 / math.sqrt(C))
    return dict(mix_k=mix_k, mix_r=mix_r, Wk=Wk, Wv=Wv, Wr=Wr)


# ---------------------------------------------------------------------------
if __name__ == "__main__":
    B = 2
    n_embd = 32
    hidden_rate = 4
    n_layer = 4
    layer_id = 1
    T, H, W = 2, 4, 4
    L = T * H * W

    key = jax.random.PRNGKey(0)
    kp, kx = jax.random.split(key)
    params = init_params(kp, n_embd, n_layer, layer_id, hidden_rate)
    x = jax.random.normal(kx, (B, L, n_embd), dtype=jnp.float32)

    ref = channelmix_ref(x, params)

    # Pad / cast weights once (cached per layer), then run the fused kernel.
    prep = prepare_channelmix_params(params)

    # Multi-tile path: exercises the in-kernel roll + halo splice across tiles.
    out_tiled = jax.block_until_ready(
        vrwkv_channelmix_forward(x, prep, (T, H, W), token_tile=8))
    # Default tiling (whole sequence fits one tile at this size).
    out_full = jax.block_until_ready(
        vrwkv_channelmix_forward(x, prep, (T, H, W)))

    assert out_tiled.shape == (B, L, n_embd)
    assert out_full.shape == (B, L, n_embd)
    # Tolerance accounts for bf16 MXU operands vs. the fp32 reference.
    err1 = float(jnp.max(jnp.abs(out_tiled - ref)))
    err2 = float(jnp.max(jnp.abs(out_full - ref)))
    assert jnp.allclose(out_tiled, ref, rtol=5e-2, atol=5e-2), err1
    assert jnp.allclose(out_full, ref, rtol=5e-2, atol=5e-2), err2

    print("KERNEL_OK")
</pallas_src>

<mosaic_0001>
module attributes {stable_mosaic.version = 11 : i64} {
  func.func @channelmix_kernel(%arg0: i32, %arg1: i32, %arg2: memref<1x8x128xf32, #tpu.memory_space<vmem>>, %arg3: memref<1x1x1x128xf32, #tpu.memory_space<vmem>>, %arg4: memref<1x1x1x128xf32, #tpu.memory_space<vmem>>, %arg5: memref<1x128xf32, #tpu.memory_space<vmem>>, %arg6: memref<1x128xf32, #tpu.memory_space<vmem>>, %arg7: memref<128x128xbf16, #tpu.memory_space<vmem>>, %arg8: memref<128x128xbf16, #tpu.memory_space<vmem>>, %arg9: memref<128x128xbf16, #tpu.memory_space<vmem>>, %arg10: memref<1x8x128xf32, #tpu.memory_space<vmem>>) attributes {dimension_semantics = [#tpu.dimension_semantics<parallel>, #tpu.dimension_semantics<parallel>], iteration_bounds = array<i64: 2, 4>, scalar_prefetch = 0 : i64, scratch_operands = 0 : i64, tpu.core_type = #tpu.core_type<tc>, window_params = [{transform_indices = @transform_0, window_bounds = array<i64: 1, 8, 128>}, {transform_indices = @transform_1, window_bounds = array<i64: 1, 1, 1, 128>}, {transform_indices = @transform_2, window_bounds = array<i64: 1, 1, 1, 128>}, {pipeline_mode = #tpu.pipeline_mode<synchronous>, transform_indices = @transform_3, window_bounds = array<i64: 1, 128>}, {pipeline_mode = #tpu.pipeline_mode<synchronous>, transform_indices = @transform_4, window_bounds = array<i64: 1, 128>}, {pipeline_mode = #tpu.pipeline_mode<synchronous>, transform_indices = @transform_5, window_bounds = array<i64: 128, 128>}, {pipeline_mode = #tpu.pipeline_mode<synchronous>, transform_indices = @transform_6, window_bounds = array<i64: 128, 128>}, {pipeline_mode = #tpu.pipeline_mode<synchronous>, transform_indices = @transform_7, window_bounds = array<i64: 128, 128>}, {transform_indices = @transform_8, window_bounds = array<i64: 1, 8, 128>}]} {
    %c0 = arith.constant 0 : index
    %c0_0 = arith.constant 0 : index
    %c0_1 = arith.constant 0 : index
    %0 = vector.load %arg2[%c0, %c0_0, %c0_1] : memref<1x8x128xf32, #tpu.memory_space<vmem>>, vector<1x8x128xf32>
    %1 = vector.shape_cast %0 : vector<1x8x128xf32> to vector<8x128xf32>
    %c1_i32 = arith.constant 1 : i32
    %2 = tpu.dynamic_rotate %1 by %c1_i32 dim 0 : vector<8x128xf32>, i32 -> vector<8x128xf32>
    %c7_i32 = arith.constant 7 : i32
    %3 = tpu.dynamic_rotate %1 by %c7_i32 dim 0 : vector<8x128xf32>, i32 -> vector<8x128xf32>
    %4 = tpu.iota {dimensions = array<i32: 0>} : vector<8x1xi32>
    %c0_2 = arith.constant 0 : index
    %c0_3 = arith.constant 0 : index
    %c0_4 = arith.constant 0 : index
    %c0_5 = arith.constant 0 : index
    %5 = vector.load %arg3[%c0_2, %c0_3, %c0_4, %c0_5] : memref<1x1x1x128xf32, #tpu.memory_space<vmem>>, vector<1x1x1x128xf32>
    %6 = vector.shape_cast %5 : vector<1x1x1x128xf32> to vector<1x128xf32>
    %c0_6 = arith.constant 0 : index
    %c0_7 = arith.constant 0 : index
    %c0_8 = arith.constant 0 : index
    %c0_9 = arith.constant 0 : index
    %7 = vector.load %arg4[%c0_6, %c0_7, %c0_8, %c0_9] : memref<1x1x1x128xf32, #tpu.memory_space<vmem>>, vector<1x1x1x128xf32>
    %8 = vector.shape_cast %7 : vector<1x1x1x128xf32> to vector<1x128xf32>
    %c0_i32 = arith.constant 0 : i32
    %9 = vector.broadcast %c0_i32 : i32 to vector<8x1xi32>
    %10 = arith.cmpi eq, %4, %9 : vector<8x1xi32>
    %11 = vector.shape_cast %10 : vector<8x1xi1> to vector<8x1xi1>
    %12 = vector.broadcast %11 : vector<8x1xi1> to vector<8x128xi1>
    %13 = vector.shape_cast %6 : vector<1x128xf32> to vector<1x128xf32>
    %14 = vector.broadcast %13 : vector<1x128xf32> to vector<8x128xf32>
    %15 = arith.select %12, %14, %2 : vector<8x128xi1>, vector<8x128xf32>
    %c7_i32_10 = arith.constant 7 : i32
    %16 = vector.broadcast %c7_i32_10 : i32 to vector<8x1xi32>
    %17 = arith.cmpi eq, %4, %16 : vector<8x1xi32>
    %18 = vector.shape_cast %17 : vector<8x1xi1> to vector<8x1xi1>
    %19 = vector.broadcast %18 : vector<8x1xi1> to vector<8x128xi1>
    %20 = vector.shape_cast %8 : vector<1x128xf32> to vector<1x128xf32>
    %21 = vector.broadcast %20 : vector<1x128xf32> to vector<8x128xf32>
    %22 = arith.select %19, %21, %3 : vector<8x128xi1>, vector<8x128xf32>
    %23 = tpu.iota {dimensions = array<i32: 1>} : vector<1x128xi32>
    %c16_i32 = arith.constant 16 : i32
    %24 = vector.broadcast %c16_i32 : i32 to vector<1x128xi32>
    %25 = arith.cmpi slt, %23, %24 : vector<1x128xi32>
    %26 = vector.shape_cast %25 : vector<1x128xi1> to vector<1x128xi1>
    %27 = vector.broadcast %26 : vector<1x128xi1> to vector<8x128xi1>
    %28 = arith.select %27, %15, %22 : vector<8x128xi1>, vector<8x128xf32>
    %29 = arith.subf %1, %28 : vector<8x128xf32>
    %c0_11 = arith.constant 0 : index
    %c0_12 = arith.constant 0 : index
    %30 = vector.load %arg5[%c0_11, %c0_12] : memref<1x128xf32, #tpu.memory_space<vmem>>, vector<1x128xf32>
    %31 = vector.broadcast %30 : vector<1x128xf32> to vector<8x128xf32>
    %32 = arith.mulf %29, %31 : vector<8x128xf32>
    %33 = arith.addf %28, %32 : vector<8x128xf32>
    %c0_13 = arith.constant 0 : index
    %c0_14 = arith.constant 0 : index
    %34 = vector.load %arg6[%c0_13, %c0_14] : memref<1x128xf32, #tpu.memory_space<vmem>>, vector<1x128xf32>
    %35 = vector.broadcast %34 : vector<1x128xf32> to vector<8x128xf32>
    %36 = arith.mulf %29, %35 : vector<8x128xf32>
    %37 = arith.addf %28, %36 : vector<8x128xf32>
    %38 = arith.truncf %33 : vector<8x128xf32> to vector<8x128xbf16>
    %c0_15 = arith.constant 0 : index
    %c0_16 = arith.constant 0 : index
    %39 = vector.load %arg7[%c0_15, %c0_16] : memref<128x128xbf16, #tpu.memory_space<vmem>>, vector<128x128xbf16>
    %cst = arith.constant dense<0.000000e+00> : vector<8x128xf32>
    %40 = tpu.matmul %38, %39, %cst {dimension_numbers = #tpu.dot_dimension_numbers<[1], [0], [0], [1], [0, 0, 1, 1], [], []>} : vector<8x128xbf16>, vector<128x128xbf16>, vector<8x128xf32> -> vector<8x128xf32>
    %cst_17 = arith.constant 0.000000e+00 : f32
    %41 = vector.broadcast %cst_17 : f32 to vector<8x128xf32>
    %42 = arith.maximumf %40, %41 : vector<8x128xf32>
    %43 = arith.mulf %42, %42 : vector<8x128xf32>
    %44 = arith.truncf %43 : vector<8x128xf32> to vector<8x128xbf16>
    %c0_18 = arith.constant 0 : index
    %c0_19 = arith.constant 0 : index
    %45 = vector.load %arg8[%c0_18, %c0_19] : memref<128x128xbf16, #tpu.memory_space<vmem>>, vector<128x128xbf16>
    %cst_20 = arith.constant dense<0.000000e+00> : vector<8x128xf32>
    %46 = tpu.matmul %44, %45, %cst_20 {dimension_numbers = #tpu.dot_dimension_numbers<[1], [0], [0], [1], [0, 0, 1, 1], [], []>} : vector<8x128xbf16>, vector<128x128xbf16>, vector<8x128xf32> -> vector<8x128xf32>
    %47 = arith.truncf %37 : vector<8x128xf32> to vector<8x128xbf16>
    %c0_21 = arith.constant 0 : index
    %c0_22 = arith.constant 0 : index
    %48 = vector.load %arg9[%c0_21, %c0_22] : memref<128x128xbf16, #tpu.memory_space<vmem>>, vector<128x128xbf16>
    %cst_23 = arith.constant dense<0.000000e+00> : vector<8x128xf32>
    %49 = tpu.matmul %47, %48, %cst_23 {dimension_numbers = #tpu.dot_dimension_numbers<[1], [0], [0], [1], [0, 0, 1, 1], [], []>} : vector<8x128xbf16>, vector<128x128xbf16>, vector<8x128xf32> -> vector<8x128xf32>
    %50 = arith.negf %49 : vector<8x128xf32>
    %51 = math.exp %50 : vector<8x128xf32>
    %cst_24 = arith.constant 1.000000e+00 : f32
    %52 = vector.broadcast %cst_24 : f32 to vector<8x128xf32>
    %53 = arith.addf %52, %51 : vector<8x128xf32>
    %54 = arith.divf %52, %53 : vector<8x128xf32>
    %55 = arith.mulf %54, %46 : vector<8x128xf32>
    %c0_25 = arith.constant 0 : index
    %c0_26 = arith.constant 0 : index
    %c0_27 = arith.constant 0 : index
    %56 = vector.load %arg10[%c0_25, %c0_26, %c0_27] : memref<1x8x128xf32, #tpu.memory_space<vmem>>, vector<1x8x128xf32>
    %57 = vector.shape_cast %56 : vector<1x8x128xf32> to vector<8x128xf32>
    %58 = vector.shape_cast %55 : vector<8x128xf32> to vector<1x8x128xf32>
    tpu.vector_store %arg10[%c0_25, %c0_26, %c0_27], %58 {strides = array<i32>} : memref<1x8x128xf32, #tpu.memory_space<vmem>>, vector<1x8x128xf32>,
    return
  }
  func.func @transform_0(%arg0: i32, %arg1: i32) -> (i32, i32, i32) {
    %c0_i32 = arith.constant 0 : i32
    %c0_i32_0 = arith.constant 0 : i32
    return %arg0, %arg1, %c0_i32 : i32, i32, i32
  }
  func.func @transform_1(%arg0: i32, %arg1: i32) -> (i32, i32, i32, i32) {
    %c0_i32 = arith.constant 0 : i32
    %c0_i32_0 = arith.constant 0 : i32
    %c0_i32_1 = arith.constant 0 : i32
    return %arg0, %arg1, %c0_i32, %c0_i32_0 : i32, i32, i32, i32
  }
  func.func @transform_2(%arg0: i32, %arg1: i32) -> (i32, i32, i32, i32) {
    %c0_i32 = arith.constant 0 : i32
    %c0_i32_0 = arith.constant 0 : i32
    %c0_i32_1 = arith.constant 0 : i32
    return %arg0, %arg1, %c0_i32, %c0_i32_0 : i32, i32, i32, i32
  }
  func.func @transform_3(%arg0: i32, %arg1: i32) -> (i32, i32) {
    %c0_i32 = arith.constant 0 : i32
    %c0_i32_0 = arith.constant 0 : i32
    %c0_i32_1 = arith.constant 0 : i32
    return %c0_i32, %c0_i32_0 : i32, i32
  }
  func.func @transform_4(%arg0: i32, %arg1: i32) -> (i32, i32) {
    %c0_i32 = arith.constant 0 : i32
    %c0_i32_0 = arith.constant 0 : i32
    %c0_i32_1 = arith.constant 0 : i32
    return %c0_i32, %c0_i32_0 : i32, i32
  }
  func.func @transform_5(%arg0: i32, %arg1: i32) -> (i32, i32) {
    %c0_i32 = arith.constant 0 : i32
    %c0_i32_0 = arith.constant 0 : i32
    %c0_i32_1 = arith.constant 0 : i32
    return %c0_i32, %c0_i32_0 : i32, i32
  }
  func.func @transform_6(%arg0: i32, %arg1: i32) -> (i32, i32) {
    %c0_i32 = arith.constant 0 : i32
    %c0_i32_0 = arith.constant 0 : i32
    %c0_i32_1 = arith.constant 0 : i32
    return %c0_i32, %c0_i32_0 : i32, i32
  }
  func.func @transform_7(%arg0: i32, %arg1: i32) -> (i32, i32) {
    %c0_i32 = arith.constant 0 : i32
    %c0_i32_0 = arith.constant 0 : i32
    %c0_i32_1 = arith.constant 0 : i32
    return %c0_i32, %c0_i32_0 : i32, i32
  }
  func.func @transform_8(%arg0: i32, %arg1: i32) -> (i32, i32, i32) {
    %c0_i32 = arith.constant 0 : i32
    %c0_i32_0 = arith.constant 0 : i32
    return %arg0, %arg1, %c0_i32 : i32, i32, i32
  }
}

</mosaic_0001>

<bundles_post_ra>
// kernel: tpu_custom_call.1
= control target key start
LH: loop header
LB: loop body
LE: loop exit
PB: predicated region body
PF: predicated region fallthrough
CT: control target
= control target key end

     0   :  { %s2037_s0 = inlined_call_operand.hbm [shape: f32[2,32,128], index: 0, kind: input, shape index: {}]   ;;  %s2038_s1 = inlined_call_operand.hbm [shape: f32[2,4,1,128], index: 1, kind: input, shape index: {}]   ;;  %s2039_s2 = inlined_call_operand.hbm [shape: f32[2,4,1,128], index: 2, kind: input, shape index: {}]   ;;  %s2040_s3 = inlined_call_operand.vmem [shape: f32[1,128], index: 3, kind: input, shape index: {}]   ;;  %s2041_s4 = inlined_call_operand.vmem [shape: f32[1,128], index: 4, kind: input, shape index: {}]   ;;  %s2042_s5 = inlined_call_operand.hbm [shape: bf16[128,128], index: 5, kind: input, shape index: {}]   ;;  %s2043_s6 = inlined_call_operand.hbm [shape: bf16[128,128], index: 6, kind: input, shape index: {}]   ;;  %s2044_s7 = inlined_call_operand.hbm [shape: bf16[128,128], index: 7, kind: input, shape index: {}]   ;;  %s2045_s8 = inlined_call_operand.hbm [shape: f32[2,32,128], index: 8, kind: output, shape index: {}]  }
   0x1   :  { %2070 = sst [smem:[#allocation30_spill]] %s2038_s1 }
   0x2   :  { %2071 = sst [smem:[#allocation31_spill]] %s2041_s4 }
   0x3   :  { %2072 = sst [smem:[#allocation32_spill]] %s2042_s5 }
   0x4   :  { %2073 = sst [smem:[#allocation33_spill]] %s2045_s8 }
   0x5   :  { %13 = vsyncpa [#allocation3], 0 }
   0x6   :  { %15 = vsyncpa [#allocation3 + $0x1], 0 }
   0x7   :  { %16 = vsyncpa [#allocation6], 0 }
   0x8   :  { %18 = vsyncpa [#allocation6 + $0x1], 0 }
   0x9   :  { %19 = vsyncpa [#allocation9], 0 }
   0xa   :  { %20 = vsyncpa [#allocation12], 0 }
   0xb   :  { %21 = vsyncpa [#allocation4], 0 }
   0xc   :  { %23 = vsyncpa [#allocation4 + $0x1], 0  ;;  %s1639_s27 = smov 0   ;;  %s1641_s28 = smov 0  }
   0xd   :  { %s1643_s29 = smov 0   ;;  %s1645_s30 = smov 0  }
   0xe   :  { %s1647_s9 = smov 0   ;;  %s1649_s10 = smov 0  }
   0xf   :  { %s1651_s11 = smov 0   ;;  %s1653_s12 = smov 0  }
  0x10 LB: > { %2074 = sst [smem:[#allocation19_spill]] %s1553_s27  ;;  %s1680_s13 = sadd.s32 4294967295, %s1581_s12   ;;  %s1581_s12 = sphi %s1653_s12, %s29_s12   ;;  %s1577_s11 = sphi %s1651_s11, %s2122_s11   ;;  %s1573_s10 = sphi %s1649_s10, %s2121_s10   ;;  %s1569_s9 = sphi %s1647_s9, %s2120_s9   ;;  %s1565_s30 = sphi %s1645_s30, %s2119_s30   ;;  %s1561_s29 = sphi %s1643_s29, %s2118_s29   ;;  %s1557_s28 = sphi %s1641_s28, %s2124_s28   ;;  %s1553_s27 = sphi %s1639_s27, %s2123_s27  }
  0x11   : > { %2075 = sst [smem:[#allocation20_spill]] %s1561_s29  ;;  %s1006_s14 = sadd.s32 4294967294, %s1581_s12  }
  0x12   : > { %2076 = sst [smem:[#allocation21_spill]] %s1565_s30  ;;  %p63_p0 = scmp.ne.s32.totalorder %s1557_s28, %s1553_s27 }
  0x13   : > { %2077 = sst [smem:[#allocation22_spill]] %s1569_s9  ;;  %p2046_p1 = scmp.eq.s32.totalorder %s1680_s13, 0 }
  0x14   : > { %2078 = sst [smem:[#allocation23_spill]] %s1573_s10  ;;  %p256_p3 = scmp.eq.s32.totalorder %s1006_s14, 7 }
  0x15   : > { %2079 = sst [smem:[#allocation24_spill]] %s1577_s11  ;;  %p1689_p4 = por %p2046_p1, %p63_p0 }
  0x16   : > { %p1007_p5 = scmp.ge.s32.totalorder %s1581_s12, 1  ;;  %p1694_p6 = por %p256_p3, %p63_p0 }
  0x17   : > { %s2080_s15 = scalar_select %p1689_p4, 1, 0 }
  0x18   : > { %s2081_s16 = scalar_select %p1694_p6, 1, 0 }
  0x19   : > { %p263_p7 = scmp.lt.s32.totalorder %s1581_s12, 9  ;;  %s1583_s18 = smov [#allocation8]  }
  0x1a   : > { %2082 = sst [smem:[#allocation25_spill]] %s2081_s16  ;;  %s281_s19 = sshll.u32 %s1583_s18, 4  ;;  %s282_s19 = int_to_ptr.vmem [resolvable:$true] %s281_s19 }
  0x1b   : > { %p1699_p8 = pnand %p1007_p5, %p263_p7  ;;  %s2085_s5 = sld [smem:[#allocation32_spill]] }
  0x1d   : > { %s2083_s17 = scalar_select %p1699_p8, 1, 0 }
  0x1e   : > { %p1166_p9 = pneg %p1699_p8 }
  0x20   : > { %p1707_p10 = pnand %p1166_p9, %p2046_p1 }
  0x21   : > { %s1297_s23 = scalar_lea.hbm %s2085_s5, 1024 }
  0x22   : > { %s2084_s20 = scalar_select %p1707_p10, 1, 0 }
  0x23   : > { %p1298_p11 = scmp.ne.s32.totalorder %s2085_s5, %s1297_s23  ;;  %p1719_p12 = pneg %p1707_p10 }
  0x24   : > { %p1304_p3 = scmp.lt.u32.totalorder %s1297_s23, %s2085_s5 }
  0x25   : > { %s2086_s26 = scalar_select %p1719_p12, 1, 0 }
  0x26   : > { %p1300_p13 = pnand %p1719_p12, %p1298_p11 }
  0x28   : > { %p1301_p0 = pneg %p1300_p13 }
  0x2a   : > { %p1306_p5 = pnand %p1304_p3, %p1301_p0 }
  0x2c   : > { %1309 = shalt.err (!%p1306_p5)
}
  0x2d   : > { %s1310_s21 = scalar_lea.vmem %s282_s19, 1024  ;;  %p1318_p2 = scmp.lt.s32.totalorder %s282_s19, %s282_s19 }
  0x2e   : > { %p1311_p7 = scmp.ne.s32.totalorder %s282_s19, %s1310_s21  ;;  %p1319_p6 = scmp.lt.s32.totalorder %s1310_s21, %s1310_s21 }
  0x30   : > { %p1313_p9 = pnand %p1311_p7, %p1719_p12  ;;  %p1320_p4 = por %p1319_p6, %p1318_p2 }
  0x32   : > { %p1314_p1 = pneg %p1313_p9 }
  0x34   : > { %p1321_p8 = pnand %p1320_p4, %p1314_p1 }
  0x36   : > { %1324 = shalt.err (!%p1321_p8)
}
  0x37   : > { %s2050_s22 = smov 64   ;;  %s2052_s23 = smov 4  }
  0x38   : > { %1169 = dma.hbm_to_vmem [thread:$0]  (!%p1707_p10), %s2085_s5, 1024, %s282_s19, [#allocation9], %s2050_s22, %s2050_s22, %s2052_s23  }
  0x39   : > { %s38_s14 = sadd.s32 1, %s1573_s10  ;;  %s41_s18 = sadd.s32 1, %s1577_s11 }
  0x3a   : > { %p39_p1 = scmp.ge.s32.totalorder %s38_s14, 4  ;;  %s50_s21 = sadd.s32 1, %s1561_s29 }
  0x3b   : > { %p57_p2 = scmp.ne.s32.totalorder %s1561_s29, %s1557_s28  ;;  %p58_p4 = scmp.eq.s32.totalorder %s1581_s12, 0 }
  0x3c   : > { %s2126_s14 = smov (%p39_p1, %s38_s14), 0  ;;  %s2128_s18 = smov (!%p39_p1, %s41_s18), %s1577_s11 }
  0x3d   : > { %2087 = sst [smem:[#allocation26_spill]] %s2126_s14  ;;  %s46_s16 = ssub.s32 %s1573_s10, %s2126_s14 }
  0x3e   : > { %p43_p6 = scmp.ge.s32.totalorder %s2128_s18, 2  ;;  %p2088_p8 = scmp.eq.s32.totalorder %s1680_s13, 7 }
  0x3f   : > { %p59_p13 = por %p58_p4, %p57_p2  ;;  %p1193_p0 = scmp.lt.s32.totalorder %s1581_s12, 8 }
  0x40   : > { %p1751_p11 = por %p2088_p8, %p57_p2  ;;  %s2130_s18 = smov (%p43_p6, %s2128_s18), 0 }
  0x41   : > { %2091 = sst [smem:[#allocation28_spill]] %s2130_s18  ;;  %s1759_s24 = sand.u32 1, %s1561_s29  }
  0x42   : > { %s2089_s19 = scalar_select %p1751_p11, 1, 0 }
  0x43   : > { %s1013_s25 = sshll.u32 %s1577_s11, 2  ;;  %s45_s22 = ssub.s32 %s1577_s11, %s2130_s18 }
  0x44   : > { %2090 = sst [smem:[#allocation27_spill]] %s2089_s19  ;;  %s1765_s23 = sadd.s32 %s1573_s10, %s1013_s25 }
  0x45   : > { %s47_s5 = sor.u32 %s46_s16, %s45_s22  ;;  %p1767_p3 = pnand %p1193_p0, %p59_p13 }
  0x46   : > { %p48_p5 = scmp.eq.s32.totalorder %s47_s5, 0  ;;  %s341_s27 = sand.u32 1, %s1581_s12  }
  0x47   : > { %s2092_s14 = scalar_select %p1767_p3, 1, 0 }
  0x48   : > { %s1773_s8 = scalar_select %p48_p5, %s1561_s29, %s50_s21  }
  0x49   : > { %s1016_s19 = sshll.u32 %s1765_s23, 4  ;;  %s2094_s1 = sld [smem:[#allocation30_spill]] }
  0x4a   : > { %2093 = sst [smem:[#allocation29_spill]] %s1773_s8  ;;  %s344_s16 = scalar_lea.vmem [#allocation5], %s1759_s24 }
  0x4b   : > { %s353_s22 = sshll.u32 %s344_s16, 4  ;;  %s1787_s5 = scalar_lea.hbm %s2039_s2, %s1016_s19  ;;  %s1782_s22 = int_to_ptr.vmem [resolvable:$true] %s353_s22 }
  0x4c   : > { %s1789_s21 = scalar_lea.sflag [#allocation6], %s341_s27  ;;  %p1795_p9 = pneg %p1767_p3 }
  0x4f   : > { %s1779_s4 = scalar_lea.hbm %s2094_s1, %s1016_s19  ;;  %s1330_s10 = scalar_lea.hbm %s2094_s1, 128 }
  0x50   : > { %s1325_s11 = scalar_lea.hbm %s1779_s4, 16  ;;  %p1331_p4 = scmp.lt.u32.totalorder %s1779_s4, %s2094_s1 }
  0x51   : > { %p1326_p7 = scmp.ne.s32.totalorder %s1779_s4, %s1325_s11  ;;  %p1332_p6 = scmp.lt.u32.totalorder %s1330_s10, %s1325_s11 }
  0x52   : > { %p1334_p13 = scmp.lt.u32.totalorder %s1325_s11, %s1779_s4 }
  0x53   : > { %p1328_p1 = pnand %p1795_p9, %p1326_p7  ;;  %p1333_p8 = por %p1332_p6, %p1331_p4 }
  0x55   : > { %p1329_p2 = pneg %p1328_p1  ;;  %p1335_p0 = por %p1334_p13, %p1333_p8 }
  0x57   : > { %p1336_p5 = pnand %p1335_p0, %p1329_p2 }
  0x59   : > { %1339 = shalt.err (!%p1336_p5)
}
  0x5a   : > { %s1340_s27 = scalar_lea.vmem %s1782_s22, 16  ;;  %s1586_s25 = smov [#allocation5]  }
  0x5b   : > { %p1341_p7 = scmp.ne.s32.totalorder %s1782_s22, %s1340_s27  ;;  %s1345_s9 = sshll.u32 %s1586_s25, 4  ;;  %s1346_s9 = int_to_ptr.vmem [resolvable:$false] %s1345_s9 }
  0x5c   : > { %s1347_s16 = scalar_lea.vmem %s1346_s9, 32  ;;  %p1348_p10 = scmp.lt.s32.totalorder %s1782_s22, %s1346_s9 }
  0x5d   : > { %p1343_p1 = pnand %p1341_p7, %p1795_p9  ;;  %p1349_p12 = scmp.lt.s32.totalorder %s1347_s16, %s1340_s27 }
  0x5f   : > { %p1344_p11 = pneg %p1343_p1  ;;  %p1350_p4 = por %p1349_p12, %p1348_p10 }
  0x61   : > { %p1351_p6 = pnand %p1350_p4, %p1344_p11 }
  0x63   : > { %1354 = shalt.err (!%p1351_p6)
}
  0x64   : > { %1182 = dma.hbm_to_vmem [thread:$0]  (!%p1767_p3), %s1779_s4, 16, %s1782_s22, %s1789_s21  }
  0x65   : > { %s1587_s10 = smov [#allocation10]   ;;  %s1588_s18 = smov [#allocation11]  }
  0x66   : > { %s294_s11 = sshll.u32 %s1587_s10, 4  ;;  %s307_s19 = sshll.u32 %s1588_s18, 4  ;;  %s295_s11 = int_to_ptr.vmem [resolvable:$true] %s294_s11  ;;  %s1819_s19 = int_to_ptr.vmem [resolvable:$true] %s307_s19 }
  0x67   : > { %s1355_s27 = scalar_lea.hbm %s2043_s6, 1024  ;;  %p2096_p12 = scmp.ne.s32.totalorder %s2086_s26, 0 }
  0x68   : > { %p1356_p10 = scmp.ne.s32.totalorder %s2043_s6, %s1355_s27  ;;  %p1362_p8 = scmp.lt.u32.totalorder %s1355_s27, %s2043_s6 }
  0x6a   : > { %p1358_p11 = pnand %p1356_p10, %p2096_p12 }
  0x6c   : > { %p1359_p2 = pneg %p1358_p11 }
  0x6e   : > { %p1364_p13 = pnand %p1362_p8, %p1359_p2 }
  0x70   : > { %1367 = shalt.err (!%p1364_p13)
}
  0x71   : > { %s1368_s22 = scalar_lea.vmem %s295_s11, 1024  ;;  %p1376_p1 = scmp.lt.s32.totalorder %s295_s11, %s295_s11 }
  0x72   : > { %p1369_p0 = scmp.ne.s32.totalorder %s295_s11, %s1368_s22  ;;  %p1377_p4 = scmp.lt.s32.totalorder %s1368_s22, %s1368_s22 }
  0x74   : > { %p1371_p5 = pnand %p1369_p0, %p2096_p12  ;;  %p1378_p6 = por %p1377_p4, %p1376_p1 }
  0x76   : > { %p1372_p7 = pneg %p1371_p5 }
  0x78   : > { %p1379_p3 = pnand %p1378_p6, %p1372_p7 }
  0x7a   : > { %1382 = shalt.err (!%p1379_p3)
}
  0x7b   : > { %p2097_p10 = scmp.ne.s32.totalorder %s2084_s20, 0  ;;  %s2098_s1 = smov 4  }
  0x7c   : > { %s2099_s10 = smov 64   ;;  %s1383_s27 = scalar_lea.hbm %s2044_s7, 1024 }
  0x7d   : > { %1172 = dma.hbm_to_vmem [thread:$0]  (!%p2097_p10), %s2043_s6, 1024, %s295_s11, [#allocation9], %s2099_s10, %s2099_s10, %s2098_s1  }
  0x7e   : > { %p1384_p11 = scmp.ne.s32.totalorder %s2044_s7, %s1383_s27  ;;  %p1390_p8 = scmp.lt.u32.totalorder %s1383_s27, %s2044_s7 }
  0x80   : > { %p1386_p3 = pnand %p1384_p11, %p2096_p12 }
  0x82   : > { %p1387_p2 = pneg %p1386_p3 }
  0x84   : > { %p1392_p13 = pnand %p1390_p8, %p1387_p2 }
  0x86   : > { %1395 = shalt.err (!%p1392_p13)
}
  0x87   : > { %s1396_s11 = scalar_lea.vmem %s1819_s19, 1024  ;;  %p1404_p1 = scmp.lt.s32.totalorder %s1819_s19, %s1819_s19 }
  0x88   : > { %p1397_p0 = scmp.ne.s32.totalorder %s1819_s19, %s1396_s11  ;;  %p1405_p4 = scmp.lt.s32.totalorder %s1396_s11, %s1396_s11 }
  0x8a   : > { %p1399_p5 = pnand %p1397_p0, %p2096_p12  ;;  %p1406_p6 = por %p1405_p4, %p1404_p1 }
  0x8c   : > { %p1400_p7 = pneg %p1399_p5 }
  0x8e   : > { %p1407_p11 = pnand %p1406_p6, %p1400_p7 }
  0x90   : > { %1410 = shalt.err (!%p1407_p11)
}
  0x91   : > { %1175 = dma.hbm_to_vmem [thread:$0]  (!%p2097_p10), %s2044_s7, 1024, %s1819_s19, [#allocation12], %s2099_s10, %s2099_s10, %s2098_s1  }
  0x92   : > { %s1012_s26 = sshll.u32 %s1759_s24, 3  ;;  %s1014_s18 = sshll.u32 %s1765_s23, 7 }
  0x93   : > { %s1873_s27 = scalar_lea.hbm %s2037_s0, %s1014_s18  ;;  %s325_s20 = scalar_lea.vmem [#allocation2], %s1012_s26 }
  0x94   : > { %s334_s16 = sshll.u32 %s325_s20, 4  ;;  %s322_s4 = scalar_lea.sflag [#allocation3], %s1759_s24  ;;  %s335_s16 = int_to_ptr.vmem [resolvable:$true] %s334_s16 }
  0x95   : > { %s1411_s22 = scalar_lea.hbm %s1873_s27, 128  ;;  %s1416_s1 = scalar_lea.hbm %s2037_s0, 1024 }
  0x96   : > { %p1412_p12 = scmp.ne.s32.totalorder %s1873_s27, %s1411_s22  ;;  %p1417_p2 = scmp.lt.u32.totalorder %s1873_s27, %s2037_s0 }
  0x97   : > { %p1418_p8 = scmp.lt.u32.totalorder %s1416_s1, %s1411_s22  ;;  %p1420_p0 = scmp.lt.u32.totalorder %s1411_s22, %s1873_s27 }
  0x98   : > { %p1414_p3 = pnand %p1412_p12, %p1795_p9 }
  0x99   : > { %p1419_p13 = por %p1418_p8, %p1417_p2 }
  0x9a   : > { %p1415_p10 = pneg %p1414_p3 }
  0x9b   : > { %p1421_p5 = por %p1420_p0, %p1419_p13 }
  0x9d   : > { %p1422_p7 = pnand %p1421_p5, %p1415_p10 }
  0x9f   : > { %1425 = shalt.err (!%p1422_p7)
}
  0xa0   : > { %s1426_s29 = scalar_lea.vmem %s335_s16, 128  ;;  %s1589_s8 = smov [#allocation2]  }
  0xa1   : > { %p1427_p1 = scmp.ne.s32.totalorder %s335_s16, %s1426_s29  ;;  %s1431_s26 = sshll.u32 %s1589_s8, 4  ;;  %s1432_s26 = int_to_ptr.vmem [resolvable:$false] %s1431_s26 }
  0xa2   : > { %s1433_s18 = scalar_lea.vmem %s1432_s26, 256  ;;  %p1434_p11 = scmp.lt.s32.totalorder %s335_s16, %s1432_s26 }
  0xa3   : > { %p1429_p4 = pnand %p1427_p1, %p1795_p9  ;;  %p1435_p12 = scmp.lt.s32.totalorder %s1433_s18, %s1426_s29 }
  0xa5   : > { %p1430_p6 = pneg %p1429_p4  ;;  %p1436_p3 = por %p1435_p12, %p1434_p11 }
  0xa7   : > { %p1437_p2 = pnand %p1436_p3, %p1430_p6 }
  0xa9   : > { %1440 = shalt.err (!%p1437_p2)
}
  0xaa   : > { %p2100_p8 = scmp.ne.s32.totalorder %s2092_s14, 0  ;;  %s363_s25 = scalar_lea.vmem [#allocation7], %s1759_s24 }
  0xab   : > { %s372_s9 = sshll.u32 %s363_s25, 4  ;;  %s1441_s20 = scalar_lea.hbm %s1787_s5, 16  ;;  %s373_s9 = int_to_ptr.vmem [resolvable:$true] %s372_s9 }
  0xac   : > { %1179 = dma.hbm_to_vmem [thread:$0]  (!%p2100_p8), %s1873_s27, 128, %s335_s16, %s322_s4  }
  0xad   : > { %p1442_p10 = scmp.ne.s32.totalorder %s1787_s5, %s1441_s20  ;;  %s1446_s23 = scalar_lea.hbm %s2039_s2, 128 }
  0xae   : > { %p1447_p5 = scmp.lt.u32.totalorder %s1787_s5, %s2039_s2  ;;  %p1448_p7 = scmp.lt.u32.totalorder %s1446_s23, %s1441_s20 }
  0xaf   : > { %p1444_p13 = pnand %p1442_p10, %p1795_p9  ;;  %p1450_p4 = scmp.lt.u32.totalorder %s1441_s20, %s1787_s5 }
  0xb0   : > { %p1449_p1 = por %p1448_p7, %p1447_p5 }
  0xb1   : > { %p1445_p0 = pneg %p1444_p13 }
  0xb2   : > { %p1451_p6 = por %p1450_p4, %p1449_p1 }
  0xb4   : > { %p1452_p11 = pnand %p1451_p6, %p1445_p0 }
  0xb6   : > { %1455 = shalt.err (!%p1452_p11)
}
  0xb7   : > { %s1456_s24 = scalar_lea.vmem %s373_s9, 16  ;;  %s1590_s27 = smov [#allocation7]  }
  0xb8   : > { %p1457_p12 = scmp.ne.s32.totalorder %s373_s9, %s1456_s24  ;;  %s1461_s16 = sshll.u32 %s1590_s27, 4  ;;  %s1462_s16 = int_to_ptr.vmem [resolvable:$false] %s1461_s16 }
  0xb9   : > { %s1463_s4 = scalar_lea.vmem %s1462_s16, 32  ;;  %p1464_p10 = scmp.lt.s32.totalorder %s373_s9, %s1462_s16 }
  0xba   : > { %p1459_p3 = pnand %p1457_p12, %p1795_p9  ;;  %p1465_p13 = scmp.lt.s32.totalorder %s1463_s4, %s1456_s24 }
  0xbc   : > { %p1460_p2 = pneg %p1459_p3  ;;  %p1466_p8 = por %p1465_p13, %p1464_p10 }
  0xbe   : > { %p1467_p5 = pnand %p1466_p8, %p1460_p2 }
  0xc0   : > { %1470 = shalt.err (!%p1467_p5)
}
  0xc1   : > { %p2101_p7 = scmp.ne.s32.totalorder %s2092_s14, 0  ;;  %p2102_p0 = scmp.ne.s32.totalorder %s2083_s17, 0 }
  0xc2   : > { %s1915_s30 = sand.u32 (!%p2102_p0), 1, %s1557_s28   ;;  %p2103_p9 = scmp.ne.s32.totalorder (!%p2102_p0), %s2080_s15, 0 }
  0xc3   : > { %1185 = dma.hbm_to_vmem [thread:$0]  (!%p2101_p7), %s1787_s5, 16, %s373_s9, %s1789_s21  }
  0xc4   : > { %381 = sbr.rel (%p2102_p0) target bundleno = 694 (0x2b6), region = 52  ;;  %s1020_s11 = sshll.u32 (!%p2102_p0), %s1915_s30, 3 }
  0xc5   : > { %s384_s29 = scalar_lea.sflag (!%p2102_p0), [#allocation3], %s1915_s30  ;;  %s387_s8 = scalar_lea.vmem (!%p2102_p0), [#allocation2], %s1020_s11 }
  0xcb   : > { %1532 = dma.done.wait (%p2103_p9), %s384_s29, 128  }
  0xcc   : > { %1534 = vsyncadd (%p2103_p9), %s384_s29, 4294967168  ;;  %s392_s17 = sand.u32 1, %s1680_s13   ;;  %s395_s5 = scalar_lea.vmem [#allocation5], %s1915_s30 }
  0xcd   : > { %s393_s14 = scalar_lea.sflag [#allocation6], %s392_s17 }
  0xce   : > { %1536 = dma.done.wait (%p2103_p9), %s393_s14, 32  }
  0xcf   : > { %1538 = vsyncadd (%p2103_p9), %s393_s14, 4294967264  ;;  %s403_s21 = scalar_lea.vmem [#allocation7], %s1915_s30  ;;  %p2104_p8 = scmp.eq.s32.totalorder %s1680_s13, 0 }
  0xd1   : > { %1540 = dma.done.wait (%p2104_p8), [#allocation9], 2048   ;;  %p2105_p1 = pmov %p2104_p8 }
  0xd3   : > { %1542 = vsyncadd (%p2105_p1), [#allocation9], 4294965248  ;;  %p2106_p4 = pmov %p2105_p1 }
  0xd4   : > { %p2107_p6 = pmov %p2105_p1 }
  0xd5   : > { %1544 = dma.done.wait (%p2106_p4), [#allocation12], 1024  }
  0xd6   : > { %1546 = vsyncadd (%p2107_p6), [#allocation12], 4294966272  ;;  %v1591_v0 = vmov 0.0   ;;  %vm1592_vm0 = vmmov 0   ;;  %v460_v1 = vlaneseq  ;;  %v1269_v2 = vld [vmem:[#allocation8] sm:$0xff]   ;;  %v1270_v3 = vld [vmem:[#allocation8 + $0x8] sm:$0xff]  }
  0xd7   : > { %1086 = vmatprep.subr.bf16.mxu0 %v1591_v0  ;;  %1102 = vmatprep.mubr.msk.bf16.mxu0 %vm1592_vm0, %v1591_v0  ;;  %v1271_v5 = vld [vmem:[#allocation8 + $0x10] sm:$0xff]   ;;  %v1025_v8 = vld [vmem:[%s395_s5] ss:$0 sm:$0xff]  ;;  %v1272_v12 = vld [vmem:[#allocation8 + $0x18] sm:$0xff]   ;;  %s2108_s25 = sld [smem:[#allocation31_spill]]  ;;  %s2109_s9 = sld [smem:[#allocation22_spill]] }
  0xd8   : > { %1106 = vmatprep.subr.bf16.mxu1 %v1591_v0  ;;  %1122 = vmatprep.mubr.msk.bf16.mxu1 %vm1592_vm0, %v1591_v0  ;;  %v461_v4 = vshrl.u32 %v460_v1, 7  ;;  %v485_v6 = vand.u32 127, %v460_v1  ;;  %v457_v7 = vld [vmem:[%s387_s8] sm:$0xff]  ;;  %v1273_v15 = vld [vmem:[#allocation8 + $0x20] sm:$0xff]   ;;  %s2110_s20 = sld [smem:[#allocation21_spill]]  ;;  %s2111_s23 = sld [smem:[#allocation27_spill]] }
  0xd9   : > { %1087 = vmatpush3.bf16.msra.mxu0 %v1269_v2  ;;  %v1026_v9 = vld [vmem:[%s403_s21] ss:$0 sm:$0xff]  ;;  %v458_v10 = vrot.slane %v457_v7, 7  ;;  %v459_v11 = vrot.slane %v457_v7, 1  ;;  %v1285_v20 = vld [vmem:[#allocation10] sm:$0xff]   ;;  %v1275_v23 = vld [vmem:[#allocation8 + $0x30] sm:$0xff]  }
  0xda   : > { %1088 = vmatprep.subr.bf16.mxu0 %v1591_v0  ;;  %vm464_vm1 = vcmp.eq.s32.totalorder %v461_v4, 0  ;;  %vm474_vm2 = vcmp.eq.s32.totalorder %v461_v4, 7  ;;  %vm486_vm3 = vcmp.lt.s32.totalorder %v485_v6, 16  ;;  %v1274_v17 = vld [vmem:[#allocation8 + $0x28] sm:$0xff]   ;;  %1107 = vmatpush3.bf16.msra.mxu1 %v1285_v20  ;;  %v1287_v24 = vld [vmem:[#allocation10 + $0x10] sm:$0xff]   ;;  %v1276_v26 = vld [vmem:[#allocation8 + $0x38] sm:$0xff]  }
  0xdb   : > { %v473_v13 = vsel %vm464_vm1, %v1025_v8, %v458_v10  ;;  %v483_v14 = vsel %vm474_vm2, %v1026_v9, %v459_v11  ;;  %v1027_v19 = vld [vmem:[%s2040_s3] ss:$0 sm:$0xff]  ;;  %1108 = vmatprep.subr.bf16.mxu1 %v1591_v0  ;;  %v1288_v27 = vld [vmem:[#allocation10 + $0x18] sm:$0xff]   ;;  %v1277_v29 = vld [vmem:[#allocation11] sm:$0xff]   ;;  %s455_s10 = scalar_lea.vmem [#allocation13], %s1020_s11  ;;  %s2112_s4 = sld [smem:[#allocation33_spill]] }
  0xdc   : > { %v489_v16 = vsel %vm486_vm3, %v473_v13, %v483_v14  ;;  %v1286_v21 = vld [vmem:[#allocation10 + $0x8] sm:$0xff]   ;;  %v1289_v30 = vld [vmem:[#allocation10 + $0x20] sm:$0xff]   ;;  %v1279_v33 = vld [vmem:[#allocation11 + $0x10] sm:$0xff]   ;;  %s850_s24 = sshll.u32 %s455_s10, 4  ;;  %s835_s8 = scalar_lea.sflag [#allocation4], %s1915_s30  ;;  %s1985_s24 = int_to_ptr.vmem [resolvable:$true] %s850_s24 }
  0xdd   : > { %1089 = vmatpush3.bf16.msra.mxu0 %v1270_v3  ;;  %v490_v18 = vsub.f32 %v457_v7, %v489_v16  ;;  %v1278_v31 = vld [vmem:[#allocation11 + $0x8] sm:$0xff]   ;;  %v1280_v34 = vld [vmem:[#allocation11 + $0x18] sm:$0xff]   ;;  %v1281_v35 = vld [vmem:[#allocation11 + $0x20] sm:$0xff]   ;;  %s1055_s22 = sshll.u32 %s2109_s9, 2  ;;  %s1471_s17 = scalar_lea.vmem %s1985_s24, 128 }
  0xde   : > { %1090 = vmatprep.subr.bf16.mxu0 %v1591_v0  ;;  %1109 = vmatpush3.bf16.msra.mxu1 %v1286_v21  ;;  %v1290_v32 = vld [vmem:[#allocation10 + $0x28] sm:$0xff]   ;;  %v1283_v39 = vld [vmem:[#allocation11 + $0x30] sm:$0xff]   ;;  %v1284_v41 = vld [vmem:[#allocation11 + $0x38] sm:$0xff]   ;;  %s846_s19 = sadd.s32 %s2110_s20, %s1055_s22  ;;  %p1472_p11 = scmp.ne.s32.totalorder %s1985_s24, %s1471_s17 }
  0xdf   : > { %v498_v22 = vmul.f32 %v1027_v19, %v490_v18  ;;  %1110 = vmatprep.subr.bf16.mxu1 %v1591_v0  ;;  %v1282_v36 = vld [vmem:[#allocation11 + $0x28] sm:$0xff]   ;;  %v1291_v43 = vld [vmem:[#allocation10 + $0x30] sm:$0xff]   ;;  %v1292_v44 = vld [vmem:[#allocation10 + $0x38] sm:$0xff]   ;;  %s1056_s1 = sshll.u32 %s846_s19, 7  ;;  %p2113_p12 = scmp.ne.s32.totalorder %s2111_s23, 0 }
  0xe0   : > { %v1028_v37 = vld [vmem:[%s2108_s25] ss:$0 sm:$0xff]  ;;  %s1593_s11 = smov [#allocation13]  }
  0xe1   : > { %1091 = vmatpush3.bf16.msra.mxu0 %v1271_v5  ;;  %v499_v25 = vadd.f32 %v498_v22, %v489_v16  ;;  %v507_v38 = vmul.f32 %v1028_v37, %v490_v18  ;;  %s1983_s29 = scalar_lea.hbm %s2112_s4, %s1056_s1  ;;  %p1473_p3 = pnand %p1472_p11, %p2113_p12 }
  0xe2   : > { %1092 = vmatprep.subr.bf16.mxu0 %v1591_v0  ;;  %1111 = vmatpush3.bf16.msra.mxu1 %v1287_v24  ;;  %s1475_s14 = sshll.u32 %s1593_s11, 4  ;;  %s1476_s14 = int_to_ptr.vmem [resolvable:$false] %s1475_s14 }
  0xe3   : > { %v509_v28 = vpack.c.bf16 %v499_v25, %v499_v25  ;;  %1112 = vmatprep.subr.bf16.mxu1 %v1591_v0  ;;  %v508_v40 = vadd.f32 %v507_v38, %v489_v16  ;;  %p1474_p2 = pneg %p1473_p3  ;;  %s1477_s5 = scalar_lea.vmem %s1476_s14, 256 }
  0xe4   : > { %p1478_p10 = scmp.lt.s32.totalorder %s1985_s24, %s1476_s14  ;;  %p1479_p13 = scmp.lt.s32.totalorder %s1477_s5, %s1471_s17 }
  0xe5   : > { %1093 = vmatpush3.bf16.msra.mxu0 %v1272_v12  ;;  %v721_v42 = vpack.c.bf16 %v508_v40, %v508_v40 }
  0xe6   : > { %1094 = vmatprep.subr.bf16.mxu0 %v1591_v0  ;;  %1113 = vmatpush3.bf16.msra.mxu1 %v1288_v27  ;;  %p1480_p5 = por %p1479_p13, %p1478_p10 }
  0xe7   : > { %1114 = vmatprep.subr.bf16.mxu1 %v1591_v0 }
  0xe8   : > { %p1481_p7 = pnand %p1480_p5, %p1474_p2 }
  0xe9   : > { %1095 = vmatpush3.bf16.msra.mxu0 %v1273_v15 }
  0xea   : > { %1096 = vmatprep.subr.bf16.mxu0 %v1591_v0  ;;  %1115 = vmatpush3.bf16.msra.mxu1 %v1289_v30 }
  0xeb   : > { %1116 = vmatprep.subr.bf16.mxu1 %v1591_v0 }
  0xed   : > { %1097 = vmatpush3.bf16.msra.mxu0 %v1274_v17 }
  0xee   : > { %1098 = vmatprep.subr.bf16.mxu0 %v1591_v0  ;;  %1117 = vmatpush3.bf16.msra.mxu1 %v1290_v32 }
  0xef   : > { %1118 = vmatprep.subr.bf16.mxu1 %v1591_v0 }
  0xf1   : > { %1099 = vmatpush3.bf16.msra.mxu0 %v1275_v23 }
  0xf2   : > { %1100 = vmatprep.subr.bf16.mxu0 %v1591_v0  ;;  %1119 = vmatpush3.bf16.msra.mxu1 %v1291_v43 }
  0xf3   : > { %1120 = vmatprep.subr.bf16.mxu1 %v1591_v0 }
  0xf5   : > { %1101 = vmatpush3.bf16.msra.mxu0 %v1276_v26 }
  0xf6   : > { %1126 = vmatprep.subr.bf16.mxu0 %v1591_v0  ;;  %1121 = vmatpush3.bf16.msra.mxu1 %v1292_v44 }
  0xf8   : > { %1103 = vmatmul.mubr.bf16.vlgmr.msra.gmra.mrb[0].mxu0 %v509_v28 }
  0xf9   : > { %1127 = vmatpush3.bf16.msra.mxu0 %v1277_v29  ;;  %1142 = vmatprep.mubr.msk.bf16.mxu0 %vm1592_vm0, %v1591_v0 }
  0xfa   : > { %1128 = vmatprep.subr.bf16.mxu0 %v1591_v0 }
  0xfd   : > { %1129 = vmatpush3.bf16.msra.mxu0 %v1278_v31 }
  0xfe   : > { %1130 = vmatprep.subr.bf16.mxu0 %v1591_v0 }
 0x101   : > { %1131 = vmatpush3.bf16.msra.mxu0 %v1279_v33 }
 0x102   : > { %1132 = vmatprep.subr.bf16.mxu0 %v1591_v0 }
 0x105   : > { %1133 = vmatpush3.bf16.msra.mxu0 %v1280_v34 }
 0x106   : > { %1134 = vmatprep.subr.bf16.mxu0 %v1591_v0 }
 0x109   : > { %1135 = vmatpush3.bf16.msra.mxu0 %v1281_v35 }
 0x10a   : > { %1136 = vmatprep.subr.bf16.mxu0 %v1591_v0 }
 0x10d   : > { %1137 = vmatpush3.bf16.msra.mxu0 %v1282_v36 }
 0x10e   : > { %1138 = vmatprep.subr.bf16.mxu0 %v1591_v0 }
 0x111   : > { %1139 = vmatpush3.bf16.msra.mxu0 %v1283_v39 }
 0x112   : > { %1140 = vmatprep.subr.bf16.mxu0 %v1591_v0 }
 0x115   : > { %1141 = vmatpush3.bf16.msra.mxu0 %v1284_v41 }
 0x118   : > { %1143 = vmatmul.mubr.bf16.vlgmr.msra.gmra.mrb[4].mxu0 %v721_v42 }
 0x1cb   : > { %v608_v45 = vpop.f32.mrb[0].mxu0 }
 0x1cc   : > { %v614_v46 = vmax.f32 %v608_v45, 0.0  ;;  %v1104_v47 = vpop.f32.mrb[1].mxu0 }
 0x1cd   : > { %v611_v48 = vpop.f32.mrb[2].mxu0 }
 0x1ce   : > { %v615_v49 = vmul.f32 %v614_v46, %v614_v46  ;;  %v1105_v50 = vpop.f32.mrb[3].mxu0 }
 0x1d0   : > { %v616_v51 = vpack.c.bf16 %v615_v49, %v615_v49 }
 0x1d2   : > { %1123 = vmatmul.mubr.bf16.vlgmr.msra.gmra.mrb[0].mxu1 %v616_v51 }
 0x1eb   : > { %v820_v52 = vpop.f32.mrb[4].mxu0 }
 0x1ec   : > { %v1144_v53 = vpop.f32.mrb[5].mxu0  ;;  %v1053_v56 = vmul.f32 -1.442695, %v820_v52 }
 0x1ed   : > { %v823_v54 = vpop.f32.mrb[6].mxu0 }
 0x1ee   : > { %v1145_v55 = vpop.f32.mrb[7].mxu0  ;;  %1293 = vpow2.f32 %v1053_v56 }
 0x1f8   : > { %v1294_v57 = vpop.eup %1293 }
 0x1f9   : > { %v829_v58 = vadd.f32 1.0, %v1294_v57 }
 0x1fb   : > { %1295 = vrcp.f32 %v829_v58 }
 0x205   : > { %v1296_v59 = vpop.eup %1295 }
 0x2a5   : > { %v715_v60 = vpop.f32.mrb[0].mxu1 }
 0x2a6   : > { %v832_v61 = vmul.f32 %v1296_v59, %v715_v60  ;;  %v1124_v62 = vpop.f32.mrb[1].mxu1 }
 0x2a7   : > { %v718_v63 = vpop.f32.mrb[2].mxu1 }
 0x2a8   : > { %833 = vst [vmem:[%s455_s10] sm:$0xff] %v832_v61  ;;  %v1125_v0 = vpop.f32.mrb[3].mxu1 }
 0x2a9   : > { %1484 = shalt.err (!%p1481_p7)
}
 0x2aa   : > { %s1485_s30 = scalar_lea.hbm %s1983_s29, 128  ;;  %s1489_s15 = scalar_lea.hbm %s2112_s4, 1024 }
 0x2ab   : > { %p1486_p0 = scmp.ne.s32.totalorder %s1983_s29, %s1485_s30  ;;  %p1490_p1 = scmp.lt.u32.totalorder %s1983_s29, %s2112_s4 }
 0x2ac   : > { %p1491_p4 = scmp.lt.u32.totalorder %s1489_s15, %s1485_s30  ;;  %p1493_p11 = scmp.lt.u32.totalorder %s1485_s30, %s1983_s29 }
 0x2ad   : > { %p1487_p9 = pnand %p1486_p0, %p2113_p12 }
 0x2ae   : > { %p1492_p6 = por %p1491_p4, %p1490_p1 }
 0x2af   : > { %p1488_p8 = pneg %p1487_p9 }
 0x2b0   : > { %p1494_p3 = por %p1493_p11, %p1492_p6 }
 0x2b2   : > { %p1495_p2 = pnand %p1494_p3, %p1488_p8 }
 0x2b4   : > { %1498 = shalt.err (!%p1495_p2)
}
 0x2b5   : > { %1164 = dma.vmem_to_hbm [thread:$0]  (%p2113_p12), %s1985_s24, 128, %s1983_s29, %s835_s8  }
 0x2b6 PF: > { %s2114_s25 = sld [smem:[#allocation19_spill]]  ;;  %s2115_s9 = sld [smem:[#allocation25_spill]] }
 0x2b7   : > { %p1197_p10 = scmp.ge.s32.totalorder %s1581_s12, 2 }
 0x2bc   : > { %s862_s20 = sand.u32 1, %s2114_s25   ;;  %p2116_p13 = scmp.ne.s32.totalorder %s2115_s9, 0 }
 0x2bd   : > { %s863_s22 = scalar_lea.sflag [#allocation4], %s862_s20 }
 0x2be   : > { %p1187_p5 = pnand %p1197_p10, %p2116_p13 }
 0x2c0   : > { %1548 = dma.done.wait (!%p1187_p5), %s863_s22, 128  }
 0x2c1   : > { %1550 = vsyncadd (!%p1187_p5), %s863_s22, 4294967168  ;;  %s29_s12 = sadd.s32 1, %s1581_s12   ;;  %s2117_s19 = sld [smem:[#allocation20_spill]] }
 0x2c2   : > { %p26_p7 = scmp.ge.s32.totalorder %s29_s12, 10   ;;  %s2118_s29 = sld [smem:[#allocation29_spill]] }
 0x2c3   : > { %s2119_s30 = sld [smem:[#allocation23_spill]]  ;;  %s2120_s9 = sld [smem:[#allocation24_spill]] }
 0x2c4   : > { %s2121_s10 = sld [smem:[#allocation26_spill]]  ;;  %s2122_s11 = sld [smem:[#allocation28_spill]] }
 0x2c5   : > { %s2123_s27 = smov %s1557_s28  ;;  %28 = sbr.rel (!%p26_p7) target bundleno = 16 (0x10), region = 133 }
 0x2c7   : > { %s2124_s28 = smov %s2117_s19 }
 0x2cc   :  { %868 = vsyncpa [#allocation3], 1 }
 0x2cd   :  { %870 = vsyncpa [#allocation3 + $0x1], 1 }
 0x2ce   :  { %871 = vsyncpa [#allocation6], 1 }
 0x2cf   :  { %873 = vsyncpa [#allocation6 + $0x1], 1 }
 0x2d0   :  { %874 = vsyncpa [#allocation9], 1 }
 0x2d1   :  { %875 = vsyncpa [#allocation12], 1 }
 0x2d2   :  { %876 = vsyncpa [#allocation4], 1 }
 0x2d3   :  { %878 = vsyncpa [#allocation4 + $0x1], 1 }

</bundles_post_ra>
